<compile_context>
chip_gen: v7x
topology: tpu7x:2x2x1
jax: 0.10.0
libtpu: 0.0.40
codegen_flags: <defaults>
</compile_context>

<pallas_src>
import jax
import jax.numpy as jnp
from jax.experimental import pallas as pl
from jax.experimental.pallas import tpu as pltpu

LANE = 128
BF16_GRANULE = 16   # bf16 packs 2 rows per sublane -> keep batch tiles on 16-row granules


def _round_up(x, m):
    return ((x + m - 1) // m) * m


def mlp_kernel(x_ref,
               w1_ref, b1_ref,
               w2_ref, b2_ref,
               w3_ref, b3_ref,
               w4_ref, b4_ref,
               o_ref):
    # All matmuls take bf16 operands (native MXU rate on v5e/v6e/v7x) and
    # accumulate in f32. Bias-add + ReLU stay in f32 on the VPU; activations
    # are only cast to bf16 at the MXU input of the next layer.
    h1 = jnp.dot(x_ref[...].astype(jnp.bfloat16), w1_ref[...],
                 preferred_element_type=jnp.float32) + b1_ref[...]
    h1 = jnp.maximum(h1, 0.0)

    h2 = jnp.dot(h1.astype(jnp.bfloat16), w2_ref[...],
                 preferred_element_type=jnp.float32) + b2_ref[...]
    h2 = jnp.maximum(h2, 0.0)

    h3 = jnp.dot(h2.astype(jnp.bfloat16), w3_ref[...],
                 preferred_element_type=jnp.float32) + b3_ref[...]
    h3 = jnp.maximum(h3, 0.0)

    out = jnp.dot(h3.astype(jnp.bfloat16), w4_ref[...],
                  preferred_element_type=jnp.float32) + b4_ref[...]
    # Lane-dense (128-multiple) unmasked bf16 store; wrapper slices/upcasts.
    o_ref[...] = out.astype(o_ref.dtype)


def prepare_params(params):
    """One-time parameter prep (hoisted out of the per-call hot path).

    Casts weights to bf16, keeps biases f32, and zero-pads:
      * hidden dim 64 -> 128 (w1/b1 out-cols, w2 in-rows, w3 out-cols, w4 in-rows)
      * output dim 16 -> 128 (w4/b4 out-cols)
    Zero pads are exact: ReLU(0 + 0) = 0 and zero rows contribute nothing, and
    padded output columns are sliced off by the wrapper.
    """
    (w1, b1), (w2, b2), (w3, b3), (w4, b4) = params
    n_feature, n_hidden = w1.shape
    n_mid = w2.shape[1]
    n_output = w4.shape[1]

    n_hid_pad = _round_up(n_hidden, LANE)
    n_mid_pad = _round_up(n_mid, LANE)
    n_out_pad = _round_up(n_output, LANE)

    def pad2(a, rows, cols):
        return jnp.pad(a, ((0, rows - a.shape[0]), (0, cols - a.shape[1])))

    w1p = pad2(w1, n_feature, n_hid_pad)
    b1p = pad2(b1, 1, n_hid_pad)
    w2p = pad2(w2, n_hid_pad, n_mid_pad)
    b2p = pad2(b2, 1, n_mid_pad)
    w3p = pad2(w3, n_mid_pad, n_hid_pad)
    b3p = pad2(b3, 1, n_hid_pad)
    w4p = pad2(w4, n_hid_pad, n_out_pad)
    b4p = pad2(b4, 1, n_out_pad)

    weights = tuple(jax.block_until_ready(w.astype(jnp.bfloat16))
                    for w in (w1p, w2p, w3p, w4p))
    biases = tuple(jax.block_until_ready(b.astype(jnp.float32))
                   for b in (b1p, b2p, b3p, b4p))
    return {"weights": weights, "biases": biases, "n_output": n_output}


def net_forward(x, prepped, *, tile_b=1024):
    """4-layer MLP (Linear->ReLU x3 -> Linear) in a single fused Pallas kernel.

    Grid is over the batch dimension; weights/biases are VMEM-resident across
    all grid steps (constant index_map); the f32 activation tile streams through
    the auto double-buffered pipeline and is cast to bf16 at the MXU input.
    """
    w1b, w2b, w3b, w4b = prepped["weights"]
    b1f, b2f, b3f, b4f = prepped["biases"]
    n_output = prepped["n_output"]

    B, n_feature = x.shape
    assert n_feature == w1b.shape[0]
    n_hid_pad = w1b.shape[1]
    n_mid_pad = w2b.shape[1]
    n_out_pad = w4b.shape[1]

    # ---- Batch tiling: pad only to a 16-row granule (bf16 sublane packing),
    # use cdiv for the grid (no near-2x padding blowups on awkward B), and cap
    # the tile so the grid has >= 2 steps when B allows it (v7x second TC).
    B_g = _round_up(B, BF16_GRANULE)
    n_tiles = max(1, pl.cdiv(B_g, tile_b))
    if B_g >= 2 * BF16_GRANULE:
        n_tiles = max(n_tiles, 2)
    tile_b_eff = _round_up(pl.cdiv(B_g, n_tiles), BF16_GRANULE)
    n_tiles = pl.cdiv(B_g, tile_b_eff)
    B_pad = n_tiles * tile_b_eff
    if B_pad != B:
        x = jnp.pad(x, ((0, B_pad - B), (0, 0)))
    grid = (n_tiles,)

    # Weights / biases: full-extent blocks with constant index_map -> no re-DMA
    # as the batch grid advances (they stay resident in VMEM).
    def resident(arr):
        return pl.BlockSpec(arr.shape, lambda i: (0, 0))

    in_specs = [
        pl.BlockSpec((tile_b_eff, n_feature), lambda i: (i, 0)),
        resident(w1b), resident(b1f),
        resident(w2b), resident(b2f),
        resident(w3b), resident(b3f),
        resident(w4b), resident(b4f),
    ]
    out_specs = pl.BlockSpec((tile_b_eff, n_out_pad), lambda i: (i, 0))

    flops = 2 * B_pad * (n_feature * n_hid_pad + n_hid_pad * n_mid_pad
                         + n_mid_pad * n_hid_pad + n_hid_pad * n_out_pad)
    bytes_accessed = (x.size * 4
                      + sum(w.size * 2 for w in (w1b, w2b, w3b, w4b))
                      + sum(b.size * 4 for b in (b1f, b2f, b3f, b4f))
                      + B_pad * n_out_pad * 2)

    out = pl.pallas_call(
        mlp_kernel,
        out_shape=jax.ShapeDtypeStruct((B_pad, n_out_pad), jnp.bfloat16),
        grid=grid,
        in_specs=in_specs,
        out_specs=out_specs,
        compiler_params=pltpu.CompilerParams(
            dimension_semantics=("parallel",),   # shards batch tiles across TCs on v7x
            vmem_limit_bytes=32 * 1024 * 1024,
        ),
        cost_estimate=pl.CostEstimate(
            flops=flops, transcendentals=0, bytes_accessed=bytes_accessed),
    )(x, w1b, b1f, w2b, b2f, w3b, b3f, w4b, b4f)

    return out[:B, :n_output].astype(jnp.float32)


def init_params(key, n_feature, n_hidden, n_output):
    """Deterministic parameter init (same shapes as the PyTorch module)."""
    dims = [(n_feature, n_hidden), (n_hidden, 256), (256, n_hidden), (n_hidden, n_output)]
    params = []
    for i, (d_in, d_out) in enumerate(dims):
        kw, kb = jax.random.split(jax.random.fold_in(key, i))
        scale = 1.0 / jnp.sqrt(jnp.float32(d_in))  # mimic nn.Linear's uniform bound
        w = jax.random.uniform(kw, (d_in, d_out), jnp.float32, -scale, scale)
        b = jax.random.uniform(kb, (1, d_out), jnp.float32, -scale, scale)
        params.append((w, b))
    return params


def reference_forward(x, params):
    h = x
    for i, (w, b) in enumerate(params):
        h = h @ w + b
        if i < len(params) - 1:
            h = jnp.maximum(h, 0.0)
    return h


if __name__ == "__main__":
    key = jax.random.PRNGKey(0)
    n_feature, n_hidden, n_output = 32, 64, 16
    batch = 8

    kx, kp = jax.random.split(key)
    x = jax.random.normal(kx, (batch, n_feature), jnp.float32)
    params = init_params(kp, n_feature, n_hidden, n_output)

    prepped = prepare_params(params)          # one-time weight prep (not per call)
    out = net_forward(x, prepped)
    out = jax.block_until_ready(out)

    ref = reference_forward(x, params)
    assert out.shape == (batch, n_output)
    # bf16 MXU operands / bf16 output store with f32 accumulation -> relaxed tolerance.
    assert jnp.allclose(out, ref, atol=5e-2, rtol=5e-2), \
        float(jnp.max(jnp.abs(out - ref)))

    print("KERNEL_OK")
</pallas_src>

<mosaic_0001>
module attributes {stable_mosaic.version = 11 : i64} {
  func.func @mlp_kernel(%arg0: i32, %arg1: memref<16x32xf32, #tpu.memory_space<vmem>>, %arg2: memref<32x128xbf16, #tpu.memory_space<vmem>>, %arg3: memref<1x128xf32, #tpu.memory_space<vmem>>, %arg4: memref<128x256xbf16, #tpu.memory_space<vmem>>, %arg5: memref<1x256xf32, #tpu.memory_space<vmem>>, %arg6: memref<256x128xbf16, #tpu.memory_space<vmem>>, %arg7: memref<1x128xf32, #tpu.memory_space<vmem>>, %arg8: memref<128x128xbf16, #tpu.memory_space<vmem>>, %arg9: memref<1x128xf32, #tpu.memory_space<vmem>>, %arg10: memref<16x128xbf16, #tpu.memory_space<vmem>>) attributes {dimension_semantics = [#tpu.dimension_semantics<parallel>], iteration_bounds = array<i64: 1>, scalar_prefetch = 0 : i64, scratch_operands = 0 : i64, tpu.core_type = #tpu.core_type<tc>, window_params = [{transform_indices = @transform_0, window_bounds = array<i64: 16, 32>}, {pipeline_mode = #tpu.pipeline_mode<synchronous>, transform_indices = @transform_1, window_bounds = array<i64: 32, 128>}, {pipeline_mode = #tpu.pipeline_mode<synchronous>, transform_indices = @transform_2, window_bounds = array<i64: 1, 128>}, {pipeline_mode = #tpu.pipeline_mode<synchronous>, transform_indices = @transform_3, window_bounds = array<i64: 128, 256>}, {pipeline_mode = #tpu.pipeline_mode<synchronous>, transform_indices = @transform_4, window_bounds = array<i64: 1, 256>}, {pipeline_mode = #tpu.pipeline_mode<synchronous>, transform_indices = @transform_5, window_bounds = array<i64: 256, 128>}, {pipeline_mode = #tpu.pipeline_mode<synchronous>, transform_indices = @transform_6, window_bounds = array<i64: 1, 128>}, {pipeline_mode = #tpu.pipeline_mode<synchronous>, transform_indices = @transform_7, window_bounds = array<i64: 128, 128>}, {pipeline_mode = #tpu.pipeline_mode<synchronous>, transform_indices = @transform_8, window_bounds = array<i64: 1, 128>}, {transform_indices = @transform_9, window_bounds = array<i64: 16, 128>}]} {
    %c0 = arith.constant 0 : index
    %c0_0 = arith.constant 0 : index
    %0 = vector.load %arg1[%c0, %c0_0] : memref<16x32xf32, #tpu.memory_space<vmem>>, vector<16x32xf32>
    %1 = arith.truncf %0 : vector<16x32xf32> to vector<16x32xbf16>
    %c0_1 = arith.constant 0 : index
    %c0_2 = arith.constant 0 : index
    %2 = vector.load %arg2[%c0_1, %c0_2] : memref<32x128xbf16, #tpu.memory_space<vmem>>, vector<32x128xbf16>
    %cst = arith.constant dense<0.000000e+00> : vector<16x128xf32>
    %3 = tpu.matmul %1, %2, %cst {dimension_numbers = #tpu.dot_dimension_numbers<[1], [0], [0], [1], [0, 0, 1, 1], [], []>} : vector<16x32xbf16>, vector<32x128xbf16>, vector<16x128xf32> -> vector<16x128xf32>
    %c0_3 = arith.constant 0 : index
    %c0_4 = arith.constant 0 : index
    %4 = vector.load %arg3[%c0_3, %c0_4] : memref<1x128xf32, #tpu.memory_space<vmem>>, vector<1x128xf32>
    %5 = vector.broadcast %4 : vector<1x128xf32> to vector<16x128xf32>
    %6 = arith.addf %3, %5 : vector<16x128xf32>
    %cst_5 = arith.constant 0.000000e+00 : f32
    %7 = vector.broadcast %cst_5 : f32 to vector<16x128xf32>
    %8 = arith.maximumf %6, %7 : vector<16x128xf32>
    %9 = arith.truncf %8 : vector<16x128xf32> to vector<16x128xbf16>
    %c0_6 = arith.constant 0 : index
    %c0_7 = arith.constant 0 : index
    %10 = vector.load %arg4[%c0_6, %c0_7] : memref<128x256xbf16, #tpu.memory_space<vmem>>, vector<128x256xbf16>
    %cst_8 = arith.constant dense<0.000000e+00> : vector<16x256xf32>
    %11 = tpu.matmul %9, %10, %cst_8 {dimension_numbers = #tpu.dot_dimension_numbers<[1], [0], [0], [1], [0, 0, 1, 1], [], []>} : vector<16x128xbf16>, vector<128x256xbf16>, vector<16x256xf32> -> vector<16x256xf32>
    %c0_9 = arith.constant 0 : index
    %c0_10 = arith.constant 0 : index
    %12 = vector.load %arg5[%c0_9, %c0_10] : memref<1x256xf32, #tpu.memory_space<vmem>>, vector<1x256xf32>
    %13 = vector.broadcast %12 : vector<1x256xf32> to vector<16x256xf32>
    %14 = arith.addf %11, %13 : vector<16x256xf32>
    %cst_11 = arith.constant 0.000000e+00 : f32
    %15 = vector.broadcast %cst_11 : f32 to vector<16x256xf32>
    %16 = arith.maximumf %14, %15 : vector<16x256xf32>
    %17 = arith.truncf %16 : vector<16x256xf32> to vector<16x256xbf16>
    %c0_12 = arith.constant 0 : index
    %c0_13 = arith.constant 0 : index
    %18 = vector.load %arg6[%c0_12, %c0_13] : memref<256x128xbf16, #tpu.memory_space<vmem>>, vector<256x128xbf16>
    %cst_14 = arith.constant dense<0.000000e+00> : vector<16x128xf32>
    %19 = tpu.matmul %17, %18, %cst_14 {dimension_numbers = #tpu.dot_dimension_numbers<[1], [0], [0], [1], [0, 0, 1, 1], [], []>} : vector<16x256xbf16>, vector<256x128xbf16>, vector<16x128xf32> -> vector<16x128xf32>
    %c0_15 = arith.constant 0 : index
    %c0_16 = arith.constant 0 : index
    %20 = vector.load %arg7[%c0_15, %c0_16] : memref<1x128xf32, #tpu.memory_space<vmem>>, vector<1x128xf32>
    %21 = vector.broadcast %20 : vector<1x128xf32> to vector<16x128xf32>
    %22 = arith.addf %19, %21 : vector<16x128xf32>
    %cst_17 = arith.constant 0.000000e+00 : f32
    %23 = vector.broadcast %cst_17 : f32 to vector<16x128xf32>
    %24 = arith.maximumf %22, %23 : vector<16x128xf32>
    %25 = arith.truncf %24 : vector<16x128xf32> to vector<16x128xbf16>
    %c0_18 = arith.constant 0 : index
    %c0_19 = arith.constant 0 : index
    %26 = vector.load %arg8[%c0_18, %c0_19] : memref<128x128xbf16, #tpu.memory_space<vmem>>, vector<128x128xbf16>
    %cst_20 = arith.constant dense<0.000000e+00> : vector<16x128xf32>
    %27 = tpu.matmul %25, %26, %cst_20 {dimension_numbers = #tpu.dot_dimension_numbers<[1], [0], [0], [1], [0, 0, 1, 1], [], []>} : vector<16x128xbf16>, vector<128x128xbf16>, vector<16x128xf32> -> vector<16x128xf32>
    %c0_21 = arith.constant 0 : index
    %c0_22 = arith.constant 0 : index
    %28 = vector.load %arg9[%c0_21, %c0_22] : memref<1x128xf32, #tpu.memory_space<vmem>>, vector<1x128xf32>
    %29 = vector.broadcast %28 : vector<1x128xf32> to vector<16x128xf32>
    %30 = arith.addf %27, %29 : vector<16x128xf32>
    %31 = arith.truncf %30 : vector<16x128xf32> to vector<16x128xbf16>
    %c0_23 = arith.constant 0 : index
    %c0_24 = arith.constant 0 : index
    %32 = vector.load %arg10[%c0_23, %c0_24] : memref<16x128xbf16, #tpu.memory_space<vmem>>, vector<16x128xbf16>
    tpu.vector_store %arg10[%c0_23, %c0_24], %31 {strides = array<i32>} : memref<16x128xbf16, #tpu.memory_space<vmem>>, vector<16x128xbf16>,
    return
  }
  func.func @transform_0(%arg0: i32) -> (i32, i32) {
    %c0_i32 = arith.constant 0 : i32
    %c0_i32_0 = arith.constant 0 : i32
    return %arg0, %c0_i32 : i32, i32
  }
  func.func @transform_1(%arg0: i32) -> (i32, i32) {
    %c0_i32 = arith.constant 0 : i32
    %c0_i32_0 = arith.constant 0 : i32
    %c0_i32_1 = arith.constant 0 : i32
    return %c0_i32, %c0_i32_0 : i32, i32
  }
  func.func @transform_2(%arg0: i32) -> (i32, i32) {
    %c0_i32 = arith.constant 0 : i32
    %c0_i32_0 = arith.constant 0 : i32
    %c0_i32_1 = arith.constant 0 : i32
    return %c0_i32, %c0_i32_0 : i32, i32
  }
  func.func @transform_3(%arg0: i32) -> (i32, i32) {
    %c0_i32 = arith.constant 0 : i32
    %c0_i32_0 = arith.constant 0 : i32
    %c0_i32_1 = arith.constant 0 : i32
    return %c0_i32, %c0_i32_0 : i32, i32
  }
  func.func @transform_4(%arg0: i32) -> (i32, i32) {
    %c0_i32 = arith.constant 0 : i32
    %c0_i32_0 = arith.constant 0 : i32
    %c0_i32_1 = arith.constant 0 : i32
    return %c0_i32, %c0_i32_0 : i32, i32
  }
  func.func @transform_5(%arg0: i32) -> (i32, i32) {
    %c0_i32 = arith.constant 0 : i32
    %c0_i32_0 = arith.constant 0 : i32
    %c0_i32_1 = arith.constant 0 : i32
    return %c0_i32, %c0_i32_0 : i32, i32
  }
  func.func @transform_6(%arg0: i32) -> (i32, i32) {
    %c0_i32 = arith.constant 0 : i32
    %c0_i32_0 = arith.constant 0 : i32
    %c0_i32_1 = arith.constant 0 : i32
    return %c0_i32, %c0_i32_0 : i32, i32
  }
  func.func @transform_7(%arg0: i32) -> (i32, i32) {
    %c0_i32 = arith.constant 0 : i32
    %c0_i32_0 = arith.constant 0 : i32
    %c0_i32_1 = arith.constant 0 : i32
    return %c0_i32, %c0_i32_0 : i32, i32
  }
  func.func @transform_8(%arg0: i32) -> (i32, i32) {
    %c0_i32 = arith.constant 0 : i32
    %c0_i32_0 = arith.constant 0 : i32
    %c0_i32_1 = arith.constant 0 : i32
    return %c0_i32, %c0_i32_0 : i32, i32
  }
  func.func @transform_9(%arg0: i32) -> (i32, i32) {
    %c0_i32 = arith.constant 0 : i32
    %c0_i32_0 = arith.constant 0 : i32
    return %arg0, %c0_i32 : i32, i32
  }
}

</mosaic_0001>

<bundles_post_ra>
// kernel: tpu_custom_call.1
= control target key start
LH: loop header
LB: loop body
LE: loop exit
PB: predicated region body
PF: predicated region fallthrough
CT: control target
= control target key end

     0   :  { %14 = vsyncpa [#allocation3], 0  ;;  %s1146_s0 = inlined_call_operand.hbm [shape: f32[16,32], index: 0, kind: input, shape index: {}]   ;;  %s1147_s1 = inlined_call_operand.hbm [shape: bf16[32,128], index: 1, kind: input, shape index: {}]   ;;  %s1148_s2 = inlined_call_operand.vmem [shape: f32[1,128], index: 2, kind: input, shape index: {}]   ;;  %s1149_s3 = inlined_call_operand.hbm [shape: bf16[128,256], index: 3, kind: input, shape index: {}]   ;;  %s1150_s4 = inlined_call_operand.vmem [shape: f32[1,256], index: 4, kind: input, shape index: {}]   ;;  %s1151_s5 = inlined_call_operand.hbm [shape: bf16[256,128], index: 5, kind: input, shape index: {}]   ;;  %s1152_s6 = inlined_call_operand.vmem [shape: f32[1,128], index: 6, kind: input, shape index: {}]   ;;  %s1153_s7 = inlined_call_operand.hbm [shape: bf16[128,128], index: 7, kind: input, shape index: {}]   ;;  %s1154_s8 = inlined_call_operand.vmem [shape: f32[1,128], index: 8, kind: input, shape index: {}]   ;;  %s1155_s9 = inlined_call_operand.hbm [shape: bf16[16,128], index: 9, kind: output, shape index: {}]  }
   0x1   :  { %15 = vsyncpa [#allocation6], 0 }
   0x2   :  { %16 = vsyncpa [#allocation9], 0 }
   0x3   :  { %17 = vsyncpa [#allocation4], 0  ;;  %s973_s30 = smov [#allocation5]   ;;  %s833_s13 = scalar_lea.hbm %s1147_s1, 256 }
   0x4   :  { %s35_s10 = sshll.u32 %s973_s30, 4  ;;  %p834_p0 = scmp.ne.s32.totalorder %s1147_s1, %s833_s13  ;;  %s36_s10 = int_to_ptr.vmem [resolvable:$true] %s35_s10 }
   0x5   :  { %p837_p1 = scmp.lt.u32.totalorder %s833_s13, %s1147_s1 }
   0x7   :  { %p839_p2 = pnand %p837_p1, %p834_p0 }
   0x9   :  { %842 = shalt.err (!%p839_p2)
}
   0xa   :  { %s843_s18 = scalar_lea.vmem %s36_s10, 256  ;;  %p848_p4 = scmp.lt.s32.totalorder %s36_s10, %s36_s10 }
   0xb   :  { %p844_p3 = scmp.ne.s32.totalorder %s36_s10, %s843_s18  ;;  %p849_p5 = scmp.lt.s32.totalorder %s843_s18, %s843_s18 }
   0xd   :  { %p850_p6 = por %p849_p5, %p848_p4 }
   0xf   :  { %p851_p7 = pnand %p850_p6, %p844_p3 }
  0x11   :  { %854 = shalt.err (!%p851_p7)
}
  0x12   :  { %s974_s19 = smov 64   ;;  %s975_s20 = smov 4  }
  0x13   :  { %41 = dma.hbm_to_vmem [thread:$0]  %s1147_s1, 256, %s36_s10, [#allocation6], %s974_s19, %s974_s19, %s975_s20  }
  0x14   :  { %s976_s23 = smov [#allocation8]   ;;  %s977_s25 = smov [#allocation2]  }
  0x15   :  { %s63_s24 = sshll.u32 %s976_s23, 4  ;;  %s23_s26 = sshll.u32 %s977_s25, 4  ;;  %s64_s24 = int_to_ptr.vmem [resolvable:$true] %s63_s24  ;;  %s24_s26 = int_to_ptr.vmem [resolvable:$true] %s23_s26 }
  0x16   :  { %s855_s29 = scalar_lea.hbm %s1151_s5, 2048 }
  0x17   :  { %p856_p8 = scmp.ne.s32.totalorder %s1151_s5, %s855_s29  ;;  %p859_p9 = scmp.lt.u32.totalorder %s855_s29, %s1151_s5 }
  0x19   :  { %p861_p10 = pnand %p859_p9, %p856_p8 }
  0x1b   :  { %864 = shalt.err (!%p861_p10)
}
  0x1c   :  { %s865_s1 = scalar_lea.vmem %s64_s24, 2048  ;;  %p870_p12 = scmp.lt.s32.totalorder %s64_s24, %s64_s24 }
  0x1d   :  { %p866_p11 = scmp.ne.s32.totalorder %s64_s24, %s865_s1  ;;  %p871_p13 = scmp.lt.s32.totalorder %s865_s1, %s865_s1 }
  0x1f   :  { %p872_p0 = por %p871_p13, %p870_p12 }
  0x21   :  { %p873_p1 = pnand %p872_p0, %p866_p11 }
  0x23   :  { %876 = shalt.err (!%p873_p1)
}
  0x24   :  { %69 = dma.hbm_to_vmem [thread:$0]  %s1151_s5, 2048, %s64_s24, [#allocation9], %s974_s19, %s974_s19, %s975_s20  }
  0x25   :  { %s877_s17 = scalar_lea.hbm %s1146_s0, 256 }
  0x26   :  { %p878_p2 = scmp.ne.s32.totalorder %s1146_s0, %s877_s17  ;;  %p881_p3 = scmp.lt.u32.totalorder %s877_s17, %s1146_s0 }
  0x28   :  { %p883_p4 = pnand %p881_p3, %p878_p2 }
  0x2a   :  { %886 = shalt.err (!%p883_p4)
}
  0x2b   :  { %s887_s25 = scalar_lea.vmem %s24_s26, 256  ;;  %p892_p6 = scmp.lt.s32.totalorder %s24_s26, %s24_s26 }
  0x2c   :  { %p888_p5 = scmp.ne.s32.totalorder %s24_s26, %s887_s25  ;;  %p893_p7 = scmp.lt.s32.totalorder %s887_s25, %s887_s25 }
  0x2e   :  { %p894_p8 = por %p893_p7, %p892_p6 }
  0x30   :  { %p895_p9 = pnand %p894_p8, %p888_p5 }
  0x32   :  { %898 = shalt.err (!%p895_p9)
}
  0x33   :  { %s978_s5 = smov 128   ;;  %s979_s24 = smov 8  }
  0x34   :  { %29 = dma.hbm_to_vmem [thread:$0]  %s1146_s0, 256, %s24_s26, [#allocation3], %s978_s5, %s978_s5, %s979_s24  }
  0x35   :  { %s980_s29 = smov [#allocation7]   ;;  %s981_s11 = smov [#allocation10]  }
  0x36   :  { %s49_s30 = sshll.u32 %s980_s29, 4  ;;  %s77_s12 = sshll.u32 %s981_s11, 4  ;;  %s50_s30 = int_to_ptr.vmem [resolvable:$true] %s49_s30  ;;  %s78_s12 = int_to_ptr.vmem [resolvable:$true] %s77_s12 }
  0x37   :  { %s899_s10 = scalar_lea.hbm %s1149_s3, 2048 }
  0x38   :  { %p900_p10 = scmp.ne.s32.totalorder %s1149_s3, %s899_s10  ;;  %p903_p11 = scmp.lt.u32.totalorder %s899_s10, %s1149_s3 }
  0x3a   :  { %p905_p12 = pnand %p903_p11, %p900_p10 }
  0x3c   :  { %908 = shalt.err (!%p905_p12)
}
  0x3d   :  { %s909_s0 = scalar_lea.vmem %s50_s30, 2048  ;;  %p914_p0 = scmp.lt.s32.totalorder %s50_s30, %s50_s30 }
  0x3e   :  { %p910_p13 = scmp.ne.s32.totalorder %s50_s30, %s909_s0  ;;  %p915_p1 = scmp.lt.s32.totalorder %s909_s0, %s909_s0 }
  0x40   :  { %p916_p2 = por %p915_p1, %p914_p0 }
  0x42   :  { %p917_p3 = pnand %p916_p2, %p910_p13 }
  0x44   :  { %920 = shalt.err (!%p917_p3)
}
  0x45   :  { %55 = dma.hbm_to_vmem [thread:$0]  %s1149_s3, 2048, %s50_s30, [#allocation6], %s978_s5, %s978_s5, %s979_s24  }
  0x46   :  { %s921_s23 = scalar_lea.hbm %s1153_s7, 1024 }
  0x47   :  { %p922_p4 = scmp.ne.s32.totalorder %s1153_s7, %s921_s23  ;;  %p925_p5 = scmp.lt.u32.totalorder %s921_s23, %s1153_s7 }
  0x49   :  { %p927_p6 = pnand %p925_p5, %p922_p4 }
  0x4b   :  { %930 = shalt.err (!%p927_p6)
}
  0x4c   :  { %s931_s11 = scalar_lea.vmem %s78_s12, 1024  ;;  %p936_p8 = scmp.lt.s32.totalorder %s78_s12, %s78_s12 }
  0x4d   :  { %p932_p7 = scmp.ne.s32.totalorder %s78_s12, %s931_s11  ;;  %p937_p9 = scmp.lt.s32.totalorder %s931_s11, %s931_s11 }
  0x4f   :  { %p938_p10 = por %p937_p9, %p936_p8 }
  0x51   :  { %p939_p11 = pnand %p938_p10, %p932_p7 }
  0x53   :  { %942 = shalt.err (!%p939_p11)
}
  0x54   :  { %83 = dma.hbm_to_vmem [thread:$0]  %s1153_s7, 1024, %s78_s12, [#allocation9], %s974_s19, %s974_s19, %s975_s20  }
  0x55   :  { %965 = dma.done.wait [#allocation3], 256  }
  0x56   :  { %966 = vsyncadd [#allocation3], 4294967040 }
  0x57   :  { %967 = dma.done.wait [#allocation6], 2304  }
  0x58   :  { %968 = vsyncadd [#allocation6], 4294964992 }
  0x59   :  { %969 = dma.done.wait [#allocation9], 3072  }
  0x5a   :  { %970 = vsyncadd [#allocation9], 4294964224  ;;  %v982_v0 = vmov 0.0   ;;  %vm983_vm0 = vmmov 0   ;;  %v783_v1 = vld [vmem:[#allocation5] sm:$0xff]   ;;  %v784_v2 = vld [vmem:[#allocation5 + $0x8] sm:$0xff]   ;;  %v194_v54 = vlaneseq }
  0x5b   :  { %742 = vmatprep.subr.bf16.mxu0 %v982_v0  ;;  %746 = vmatprep.mubr.msk.bf16.mxu0 %vm983_vm0, %v982_v0  ;;  %v102_v3 = vld [vmem:[#allocation2] sm:$0xff]  ;;  %v103_v4 = vld [vmem:[#allocation2 + $0x8] sm:$0xff]  ;;  %v788_v7 = vld [vmem:[#allocation7 + $0x14] ss:$8 sps:$4 sm:$0xff]   ;;  %vm128_vm1 = vcmask 261120   ;;  %v984_v22 = vmov 0  }
  0x5c   :  { %743 = vmatpush3.bf16.msra.mxu0 %v783_v1  ;;  %v785_v5 = vld [vmem:[#allocation7 + $0x4] ss:$8 sps:$4 sm:$0xff]   ;;  %v787_v6 = vld [vmem:[#allocation7] ss:$8 sps:$4 sm:$0xff]   ;;  %v104_v8 = vpack.c.bf16 %v103_v4, %v102_v3  ;;  %v790_v9 = vld [vmem:[#allocation7 + $0x10] ss:$8 sps:$4 sm:$0xff]   ;;  %316 = vmatprep.mubr.bf16.mxu1 %v984_v22 }
  0x5d   :  { %744 = vmatprep.subr.bf16.mxu0 %v982_v0  ;;  %284 = vmatprep.subr.bf16.mxu1 %v785_v5  ;;  %v791_v10 = vld [vmem:[#allocation7 + $0x24] ss:$8 sps:$4 sm:$0xff]   ;;  %v793_v11 = vld [vmem:[#allocation7 + $0x20] ss:$8 sps:$4 sm:$0xff]   ;;  %v794_v12 = vld [vmem:[#allocation7 + $0x34] ss:$8 sps:$4 sm:$0xff]  }
  0x5e   :  { %285 = vmatpush1.bf16.msra.mxu1 %v787_v6  ;;  %v796_v13 = vld [vmem:[#allocation7 + $0x30] ss:$8 sps:$4 sm:$0xff]   ;;  %v797_v14 = vld [vmem:[#allocation7 + $0x44] ss:$8 sps:$4 sm:$0xff]   ;;  %v799_v15 = vld [vmem:[#allocation7 + $0x40] ss:$8 sps:$4 sm:$0xff]  }
  0x5f   :  { %286 = vmatprep.subr.bf16.mxu1 %v788_v7  ;;  %v800_v16 = vld [vmem:[#allocation7 + $0x54] ss:$8 sps:$4 sm:$0xff]   ;;  %v802_v17 = vld [vmem:[#allocation7 + $0x50] ss:$8 sps:$4 sm:$0xff]   ;;  %v803_v18 = vld [vmem:[#allocation7 + $0x64] ss:$8 sps:$4 sm:$0xff]  }
  0x60   :  { %745 = vmatpush3.bf16.msra.mxu0 %v784_v2  ;;  %v805_v19 = vld [vmem:[#allocation7 + $0x60] ss:$8 sps:$4 sm:$0xff]   ;;  %v806_v20 = vld [vmem:[#allocation7 + $0x74] ss:$8 sps:$4 sm:$0xff]   ;;  %v808_v21 = vld [vmem:[#allocation7 + $0x70] ss:$8 sps:$4 sm:$0xff]  }
  0x61   :  { %v809_v23 = vld [vmem:[#allocation8 + $0x40] sm:$0xff]   ;;  %v811_v25 = vld [vmem:[#allocation8 + $0x48] sm:$0xff]   ;;  %v813_v27 = vld [vmem:[#allocation8 + $0x50] sm:$0xff]   ;;  %v195_v55 = vshrl.u32 %v194_v54, 7  ;;  %s985_s10 = smov [#allocation11]  }
  0x62   :  { %287 = vmatpush1.bf16.msra.mxu1 %v790_v9  ;;  %v810_v24 = vld [vmem:[#allocation8] sm:$0xff]   ;;  %711 = vmatprep.subr.bf16.mxu0 %v809_v23  ;;  %v812_v26 = vld [vmem:[#allocation8 + $0x8] sm:$0xff]   ;;  %v814_v28 = vld [vmem:[#allocation8 + $0x10] sm:$0xff]  }
  0x63   :  { %747 = vmatmul.mubr.msk.bf16.vlgmr.msra.gmra.mrb[0].mxu0 %vm128_vm1, %v104_v8  ;;  %288 = vmatprep.subr.bf16.mxu1 %v791_v10  ;;  %v815_v29 = vld [vmem:[#allocation8 + $0x58] sm:$0xff]   ;;  %v817_v31 = vld [vmem:[#allocation8 + $0x60] sm:$0xff]   ;;  %v819_v33 = vld [vmem:[#allocation8 + $0x68] sm:$0xff]   ;;  %v196_v56 = vsub.s32 0, %v195_v55  ;;  %v200_v58 = vsub.s32 1, %v195_v55 }
  0x64   :  { %712 = vmatpush3.bf16.msra.mxu0 %v810_v24  ;;  %v816_v30 = vld [vmem:[#allocation8 + $0x18] sm:$0xff]   ;;  %v818_v32 = vld [vmem:[#allocation8 + $0x20] sm:$0xff]   ;;  %v820_v44 = vld [vmem:[#allocation8 + $0x28] sm:$0xff]  }
  0x65   :  { %713 = vmatprep.subr.bf16.mxu0 %v811_v25  ;;  %v653_v34 = vld [vmem:[%s1148_s2] ss:$0 sm:$0xff]  ;;  %v821_v45 = vld [vmem:[#allocation8 + $0x70] sm:$0xff]   ;;  %v823_v47 = vld [vmem:[#allocation8 + $0x78] sm:$0xff]  }
  0x66   :  { %289 = vmatpush1.bf16.msra.mxu1 %v793_v11  ;;  %v822_v46 = vld [vmem:[#allocation8 + $0x30] sm:$0xff]   ;;  %v824_v48 = vld [vmem:[#allocation8 + $0x38] sm:$0xff]   ;;  %v825_v49 = vld [vmem:[#allocation10] sm:$0xff]  }
  0x67   :  { %290 = vmatprep.subr.bf16.mxu1 %v794_v12  ;;  %v826_v50 = vld [vmem:[#allocation10 + $0x8] sm:$0xff]   ;;  %v827_v51 = vld [vmem:[#allocation10 + $0x10] sm:$0xff]   ;;  %v828_v52 = vld [vmem:[#allocation10 + $0x18] sm:$0xff]  }
  0x68   :  { %714 = vmatpush3.bf16.msra.mxu0 %v812_v26  ;;  %v829_v53 = vld [vmem:[#allocation10 + $0x20] sm:$0xff]   ;;  %v830_v12 = vld [vmem:[#allocation10 + $0x28] sm:$0xff]  }
  0x69   :  { %715 = vmatprep.subr.bf16.mxu0 %v813_v27  ;;  %v192_v57 = vld [vmem:[%s1150_s4] sm:$0x3] }
  0x6a   :  { %291 = vmatpush1.bf16.msra.mxu1 %v796_v13  ;;  %v197_v59 = vrot.slane %v192_v57, %v196_v56  ;;  %v201_v60 = vrot.slane %v192_v57, %v200_v58  ;;  %v831_v13 = vld [vmem:[#allocation10 + $0x30] sm:$0xff]  }
  0x6b   :  { %292 = vmatprep.subr.bf16.mxu1 %v797_v14  ;;  %v832_v14 = vld [vmem:[#allocation10 + $0x38] sm:$0xff]  }
  0x6c   :  { %716 = vmatpush3.bf16.msra.mxu0 %v814_v28 }
  0x6d   :  { %717 = vmatprep.subr.bf16.mxu0 %v815_v29 }
  0x6e   :  { %293 = vmatpush1.bf16.msra.mxu1 %v799_v15 }
  0x6f   :  { %294 = vmatprep.subr.bf16.mxu1 %v800_v16  ;;  %v673_v16 = vld [vmem:[%s1152_s6] ss:$0 sm:$0xff]  ;;  %s639_s6 = sshll.u32 %s985_s10, 4  ;;  %s640_s6 = int_to_ptr.vmem [resolvable:$true] %s639_s6 }
  0x70   :  { %718 = vmatpush3.bf16.msra.mxu0 %v816_v30  ;;  %s943_s14 = scalar_lea.vmem %s640_s6, 128  ;;  %p948_p13 = scmp.lt.s32.totalorder %s640_s6, %s640_s6 }
  0x71   :  { %719 = vmatprep.subr.bf16.mxu0 %v817_v31  ;;  %p944_p12 = scmp.ne.s32.totalorder %s640_s6, %s943_s14  ;;  %p949_p0 = scmp.lt.s32.totalorder %s943_s14, %s943_s14 }
  0x72   :  { %295 = vmatpush1.bf16.msra.mxu1 %v802_v17 }
  0x73   :  { %296 = vmatprep.subr.bf16.mxu1 %v803_v18  ;;  %p950_p1 = por %p949_p0, %p948_p13 }
  0x74   :  { %720 = vmatpush3.bf16.msra.mxu0 %v818_v32 }
  0x75   :  { %721 = vmatprep.subr.bf16.mxu0 %v819_v33  ;;  %p951_p2 = pnand %p950_p1, %p944_p12 }
  0x76   :  { %297 = vmatpush1.bf16.msra.mxu1 %v805_v19 }
  0x77   :  { %298 = vmatprep.subr.bf16.mxu1 %v806_v20 }
  0x78   :  { %722 = vmatpush3.bf16.msra.mxu0 %v820_v44 }
  0x79   :  { %723 = vmatprep.subr.bf16.mxu0 %v821_v45 }
  0x7a   :  { %299 = vmatpush1.bf16.msra.mxu1 %v808_v21 }
  0x7b   :  { %750 = vmatprep.subr.bf16.mxu1 %v982_v0 }
  0x7c   :  { %724 = vmatpush3.bf16.msra.mxu0 %v822_v46 }
  0x7d   :  { %725 = vmatprep.subr.bf16.mxu0 %v823_v47 }
  0x80   :  { %726 = vmatpush3.bf16.msra.mxu0 %v824_v48 }
 0x136   :  { %v166_v35 = vpop.f32.mrb[0].mxu0 }
 0x137   :  { %v167_v36 = vadd.f32 %v653_v34, %v166_v35  ;;  %v748_v37 = vpop.f32.mrb[1].mxu0 }
 0x138   :  { %v169_v38 = vpop.f32.mrb[2].mxu0 }
 0x139   :  { %v170_v39 = vadd.f32 %v653_v34, %v169_v38  ;;  %v749_v40 = vpop.f32.mrb[3].mxu0  ;;  %v173_v41 = vmax.f32 %v167_v36, 0.0 }
 0x13b   :  { %v174_v42 = vmax.f32 %v170_v39, 0.0 }
 0x13d   :  { %v175_v43 = vpack.c.bf16 %v174_v42, %v173_v41 }
 0x13f   :  { %317 = vmatmul.mubr.bf16.vlgmr.msra.gmra.mrb[0].mxu1 %v175_v43 }
 0x140   :  { %766 = vmatprep.mubr.msk.bf16.mxu1 %vm983_vm0, %v982_v0  ;;  %751 = vmatpush3.bf16.msra.mxu1 %v825_v49 }
 0x141   :  { %752 = vmatprep.subr.bf16.mxu1 %v982_v0 }
 0x144   :  { %753 = vmatpush3.bf16.msra.mxu1 %v826_v50 }
 0x145   :  { %754 = vmatprep.subr.bf16.mxu1 %v982_v0 }
 0x148   :  { %755 = vmatpush3.bf16.msra.mxu1 %v827_v51 }
 0x149   :  { %756 = vmatprep.subr.bf16.mxu1 %v982_v0 }
 0x14c   :  { %757 = vmatpush3.bf16.msra.mxu1 %v828_v52 }
 0x14d   :  { %758 = vmatprep.subr.bf16.mxu1 %v982_v0 }
 0x150   :  { %759 = vmatpush3.bf16.msra.mxu1 %v829_v53 }
 0x151   :  { %760 = vmatprep.subr.bf16.mxu1 %v982_v0 }
 0x154   :  { %761 = vmatpush3.bf16.msra.mxu1 %v830_v12 }
 0x155   :  { %762 = vmatprep.subr.bf16.mxu1 %v982_v0 }
 0x158   :  { %763 = vmatpush3.bf16.msra.mxu1 %v831_v13 }
 0x159   :  { %764 = vmatprep.subr.bf16.mxu1 %v982_v0  ;;  %v690_v0 = vld [vmem:[%s1154_s8] ss:$0 sm:$0xff] }
 0x15c   :  { %765 = vmatpush3.bf16.msra.mxu1 %v832_v14 }
 0x212   :  { %v318_v61 = vpop.f32.mrb[0].mxu1 }
 0x213   :  { %v319_v62 = vadd.f32 %v318_v61, %v197_v59  ;;  %v320_v63 = vpop.f32.mrb[1].mxu1 }
 0x214   :  { %v321_v1 = vadd.f32 %v320_v63, %v201_v60  ;;  %v322_v2 = vpop.f32.mrb[2].mxu1 }
 0x215   :  { %v323_v3 = vadd.f32 %v322_v2, %v197_v59  ;;  %v324_v4 = vpop.f32.mrb[3].mxu1  ;;  %v327_v6 = vmax.f32 %v319_v62, 0.0 }
 0x216   :  { %v325_v5 = vadd.f32 %v324_v4, %v201_v60  ;;  %v328_v8 = vmax.f32 %v321_v1, 0.0 }
 0x217   :  { %v329_v7 = vmax.f32 %v323_v3, 0.0 }
 0x218   :  { %v330_v9 = vmax.f32 %v325_v5, 0.0 }
 0x219   :  { %v331_v10 = vpack.c.bf16 %v329_v7, %v327_v6 }
 0x21a   :  { %v332_v11 = vpack.c.bf16 %v330_v9, %v328_v8 }
 0x21c   :  { %500 = vmatprep.mubr.bf16.mxu0 %v332_v11 }
 0x21d   :  { %501 = vmatmul.mubr.bf16.vlgmr.msra.gmra.mrb[4].mxu0 %v331_v10 }
 0x2f0   :  { %v727_v15 = vpop.f32.mrb[4].mxu0 }
 0x2f1   :  { %v728_v17 = vpop.f32.mrb[5].mxu0 }
 0x2f2   :  { %v729_v18 = vadd.f32 %v728_v17, %v727_v15  ;;  %v730_v19 = vpop.f32.mrb[6].mxu0 }
 0x2f3   :  { %v731_v20 = vpop.f32.mrb[7].mxu0 }
 0x2f4   :  { %v503_v21 = vadd.f32 %v729_v18, %v673_v16  ;;  %v732_v22 = vadd.f32 %v731_v20, %v730_v19 }
 0x2f6   :  { %v506_v23 = vadd.f32 %v732_v22, %v673_v16  ;;  %v509_v24 = vmax.f32 %v503_v21, 0.0 }
 0x2f8   :  { %v510_v25 = vmax.f32 %v506_v23, 0.0 }
 0x2fa   :  { %v511_v26 = vpack.c.bf16 %v510_v25, %v509_v24 }
 0x2fc   :  { %767 = vmatmul.mubr.bf16.vlgmr.msra.gmra.mrb[4].mxu1 %v511_v26 }
 0x3cf   :  { %v617_v27 = vpop.f32.mrb[4].mxu1 }
 0x3d0   :  { %v768_v28 = vpop.f32.mrb[5].mxu1  ;;  %v618_v30 = vadd.f32 %v690_v0, %v617_v27 }
 0x3d1   :  { %v620_v29 = vpop.f32.mrb[6].mxu1 }
 0x3d2   :  { %v621_v31 = vadd.f32 %v690_v0, %v620_v29  ;;  %v769_v32 = vpop.f32.mrb[7].mxu1 }
 0x3d4   :  { %v706_v33 = vpack.c.bf16 %v621_v31, %v618_v30 }
 0x3d6   :  { %707 = vst [vmem:[#allocation11] sm:$0xff] %v706_v33  }
 0x3d7   :  { %954 = shalt.err (!%p951_p2)
}
 0x3d8   :  { %s955_s16 = scalar_lea.hbm %s1155_s9, 128 }
 0x3d9   :  { %p956_p3 = scmp.ne.s32.totalorder %s1155_s9, %s955_s16  ;;  %p959_p4 = scmp.lt.u32.totalorder %s955_s16, %s1155_s9 }
 0x3db   :  { %p961_p5 = pnand %p959_p4, %p956_p3 }
 0x3dd   :  { %964 = shalt.err (!%p961_p5)
}
 0x3de   :  { %645 = dma.vmem_to_hbm [thread:$0]  %s640_s6, 128, %s1155_s9, [#allocation4], %s974_s19, %s974_s19, %s975_s20  }
 0x3df   :  { %971 = dma.done.wait [#allocation4], 128  }
 0x3e0   :  { %972 = vsyncadd [#allocation4], 4294967168 }
 0x3e1   :  { %649 = vsyncpa [#allocation3], 1 }
 0x3e2   :  { %650 = vsyncpa [#allocation6], 1 }
 0x3e3   :  { %651 = vsyncpa [#allocation9], 1 }
 0x3e4   :  { %652 = vsyncpa [#allocation4], 1 }

</bundles_post_ra>
